<compile_context>
chip_gen: v7x
topology: tpu7x:2x2x1
jax: 0.10.0
libtpu: 0.0.40
codegen_flags: <defaults>
</compile_context>

<pallas_src>
import functools

import jax
import jax.numpy as jnp
from jax.experimental import pallas as pl
from jax.experimental.pallas import tpu as pltpu

# TODO(synk): self.layers is an externally supplied nn.ModuleList with no
# concrete definition in the reference module; it is treated as empty
# (identity), so the mask argument is unused.


def _layernorm_kernel(x_ref, alpha_ref, bias_ref, o_ref, *, n_features: int,
                      eps: float):
    # x_ref: (TR, F) tile of rows; F is the full feature extent (no padding).
    # alpha_ref / bias_ref: (1, F).
    x = x_ref[...].astype(jnp.float32)

    # Two-pass statistics over the in-VMEM tile (hidden under DMA; robust
    # against cancellation, unlike s2 - n*mean^2).
    mean = jnp.sum(x, axis=-1, keepdims=True) * (1.0 / float(n_features))
    centered = x - mean
    # torch.Tensor.std uses the unbiased estimator (divide by N-1).
    # n_features == 1 => rdof = inf => var = 0*inf = nan, matching torch.
    rdof = (1.0 / float(n_features - 1)) if n_features > 1 else float("inf")
    var = jnp.sum(centered * centered, axis=-1, keepdims=True) * rdof
    std = jnp.sqrt(var)

    # eps is added to std (not var), matching the reference. EUP approx
    # reciprocal of the (TR,1) column + one Newton step -> near-exact; turns
    # the per-element divide into multiplies.
    denom = std + eps
    inv = pl.reciprocal(denom, approx=True)
    inv = inv * (2.0 - denom * inv)

    alpha = alpha_ref[...].astype(jnp.float32)
    bias = bias_ref[...].astype(jnp.float32)
    o_ref[...] = (centered * inv * alpha + bias).astype(o_ref.dtype)


def encoder_forward(x, mask, alpha, bias, *, eps: float = 1e-6,
                    vmem_fraction: float = 0.4, min_grid_steps: int = 4):
    """Encoder with an empty layer list == final LayerNormalization over dim -1.

    x:     (batch, seq, features)
    mask:  unused (only consumed by the (empty) layer stack)
    alpha: (features,) scale
    bias:  (features,) shift
    """
    del mask  # only used by the (empty) layer stack
    b, s, f = x.shape
    rows = b * s
    itemsize = jnp.dtype(x.dtype).itemsize

    # Generation-aware VMEM capacity (v7x: 64 MiB/TC, v5e/v6e: 128 MiB).
    try:
        vmem_cap = int(pltpu.get_tpu_info().vmem_capacity_bytes)
    except Exception:
        vmem_cap = 64 * 1024 * 1024  # most conservative (v7x)

    # Per-row VMEM footprint during one grid step:
    #   input + output tiles, each double-buffered  -> 4 * itemsize bytes
    #   f32 compute temporaries (x, centered, out)  -> ~12 bytes
    bytes_per_row = f * (4 * itemsize + 12)
    budget = int(vmem_cap * vmem_fraction)
    tile_rows = max(8, budget // max(bytes_per_row, 1))
    tile_rows = (tile_rows // 8) * 8

    # Keep the grid at >= ~min_grid_steps steps so both v7x TensorCores get
    # work via the "parallel" axis (measured no-op on single-TC v5e/v6e).
    per_step_rows = -(-rows // min_grid_steps)          # ceil(rows / steps)
    per_step_rows = ((per_step_rows + 7) // 8) * 8      # multiple of 8
    tile_rows = max(8, min(tile_rows, per_step_rows))

    grid = (pl.cdiv(rows, tile_rows),)

    # Scoped-VMEM limit: comfortably above usage, below physical capacity.
    # (v5e's scoped default is only 16 MiB, so the explicit value matters.)
    vmem_limit = min(int(vmem_cap * 3) // 4, 100 * 1024 * 1024)

    # Metadata-only reshapes (no HBM copies).
    x2 = x.reshape(rows, f)
    alpha2 = alpha.reshape(1, f)
    bias2 = bias.reshape(1, f)

    out = pl.pallas_call(
        functools.partial(_layernorm_kernel, n_features=f, eps=eps),
        out_shape=jax.ShapeDtypeStruct((rows, f), x.dtype),
        grid_spec=pltpu.PrefetchScalarGridSpec(
            num_scalar_prefetch=0,
            grid=grid,
            in_specs=[
                pl.BlockSpec((tile_rows, f), lambda i: (i, 0)),
                pl.BlockSpec((1, f), lambda i: (0, 0)),
                pl.BlockSpec((1, f), lambda i: (0, 0)),
            ],
            out_specs=pl.BlockSpec((tile_rows, f), lambda i: (i, 0)),
        ),
        compiler_params=pltpu.CompilerParams(
            dimension_semantics=("parallel",),
            vmem_limit_bytes=vmem_limit,
        ),
    )(x2, alpha2, bias2)

    return out.reshape(b, s, f)


def _reference(x, alpha, bias, eps=1e-6):
    mean = jnp.mean(x, axis=-1, keepdims=True)
    std = jnp.std(x, axis=-1, keepdims=True, ddof=1)  # torch unbiased std
    return alpha * (x - mean) / (std + eps) + bias


if __name__ == "__main__":
    key = jax.random.PRNGKey(0)
    batch, seq, features = 2, 8, 32

    kx, _ = jax.random.split(key)
    x = jax.random.normal(kx, (batch, seq, features), dtype=jnp.float32)
    # padding-style mask (unused by the empty layer stack)
    mask = jnp.ones((batch, 1, 1, seq), dtype=jnp.float32)

    # deterministic parameter init matching LayerNormalization.__init__
    alpha = jnp.ones((features,), dtype=jnp.float32)
    bias = jnp.zeros((features,), dtype=jnp.float32)

    out = encoder_forward(x, mask, alpha, bias)
    out = jax.block_until_ready(out)

    ref = _reference(x, alpha, bias)
    assert out.shape == (batch, seq, features)
    assert jnp.allclose(out, ref, atol=1e-4, rtol=1e-4), "mismatch vs reference"

    print("KERNEL_OK")
</pallas_src>

<mosaic_0001>
module attributes {stable_mosaic.version = 11 : i64} {
  func.func @_layernorm_kernel(%arg0: i32, %arg1: memref<8x32xf32, #tpu.memory_space<vmem>>, %arg2: memref<1x32xf32, #tpu.memory_space<vmem>>, %arg3: memref<1x32xf32, #tpu.memory_space<vmem>>, %arg4: memref<8x32xf32, #tpu.memory_space<vmem>>) attributes {dimension_semantics = [#tpu.dimension_semantics<parallel>], iteration_bounds = array<i64: 2>, scalar_prefetch = 0 : i64, scratch_operands = 0 : i64, tpu.core_type = #tpu.core_type<tc>, window_params = [{transform_indices = @transform_0, window_bounds = array<i64: 8, 32>}, {pipeline_mode = #tpu.pipeline_mode<synchronous>, transform_indices = @transform_1, window_bounds = array<i64: 1, 32>}, {pipeline_mode = #tpu.pipeline_mode<synchronous>, transform_indices = @transform_2, window_bounds = array<i64: 1, 32>}, {transform_indices = @transform_3, window_bounds = array<i64: 8, 32>}]} {
    %c0 = arith.constant 0 : index
    %c0_0 = arith.constant 0 : index
    %0 = vector.load %arg1[%c0, %c0_0] : memref<8x32xf32, #tpu.memory_space<vmem>>, vector<8x32xf32>
    %cst = arith.constant dense<0.000000e+00> : vector<8xf32>
    %1 = vector.multi_reduction <add>, %0, %cst [1] : vector<8x32xf32> to vector<8xf32>
    %2 = vector.shape_cast %1 : vector<8xf32> to vector<8x1xf32>
    %cst_1 = arith.constant 3.125000e-02 : f32
    %3 = vector.broadcast %cst_1 : f32 to vector<8x1xf32>
    %4 = arith.mulf %2, %3 : vector<8x1xf32>
    %5 = vector.broadcast %4 : vector<8x1xf32> to vector<8x32xf32>
    %6 = arith.subf %0, %5 : vector<8x32xf32>
    %7 = arith.mulf %6, %6 : vector<8x32xf32>
    %cst_2 = arith.constant dense<0.000000e+00> : vector<8xf32>
    %8 = vector.multi_reduction <add>, %7, %cst_2 [1] : vector<8x32xf32> to vector<8xf32>
    %9 = vector.shape_cast %8 : vector<8xf32> to vector<8x1xf32>
    %cst_3 = arith.constant 0.0322580636 : f32
    %10 = vector.broadcast %cst_3 : f32 to vector<8x1xf32>
    %11 = arith.mulf %9, %10 : vector<8x1xf32>
    %12 = math.sqrt %11 : vector<8x1xf32>
    %cst_4 = arith.constant 9.99999997E-7 : f32
    %13 = vector.broadcast %cst_4 : f32 to vector<8x1xf32>
    %14 = arith.addf %12, %13 : vector<8x1xf32>
    %15 = tpu.reciprocal %14 {approx = true} : vector<8x1xf32> -> vector<8x1xf32>
    %16 = arith.mulf %14, %15 : vector<8x1xf32>
    %cst_5 = arith.constant 2.000000e+00 : f32
    %17 = vector.broadcast %cst_5 : f32 to vector<8x1xf32>
    %18 = arith.subf %17, %16 : vector<8x1xf32>
    %19 = arith.mulf %15, %18 : vector<8x1xf32>
    %c0_6 = arith.constant 0 : index
    %c0_7 = arith.constant 0 : index
    %20 = vector.load %arg2[%c0_6, %c0_7] : memref<1x32xf32, #tpu.memory_space<vmem>>, vector<1x32xf32>
    %c0_8 = arith.constant 0 : index
    %c0_9 = arith.constant 0 : index
    %21 = vector.load %arg3[%c0_8, %c0_9] : memref<1x32xf32, #tpu.memory_space<vmem>>, vector<1x32xf32>
    %22 = vector.broadcast %19 : vector<8x1xf32> to vector<8x32xf32>
    %23 = arith.mulf %6, %22 : vector<8x32xf32>
    %24 = vector.broadcast %20 : vector<1x32xf32> to vector<8x32xf32>
    %25 = arith.mulf %23, %24 : vector<8x32xf32>
    %26 = vector.broadcast %21 : vector<1x32xf32> to vector<8x32xf32>
    %27 = arith.addf %25, %26 : vector<8x32xf32>
    %c0_10 = arith.constant 0 : index
    %c0_11 = arith.constant 0 : index
    %28 = vector.load %arg4[%c0_10, %c0_11] : memref<8x32xf32, #tpu.memory_space<vmem>>, vector<8x32xf32>
    tpu.vector_store %arg4[%c0_10, %c0_11], %27 {strides = array<i32>} : memref<8x32xf32, #tpu.memory_space<vmem>>, vector<8x32xf32>,
    return
  }
  func.func @transform_0(%arg0: i32) -> (i32, i32) {
    %c0_i32 = arith.constant 0 : i32
    %c0_i32_0 = arith.constant 0 : i32
    return %arg0, %c0_i32 : i32, i32
  }
  func.func @transform_1(%arg0: i32) -> (i32, i32) {
    %c0_i32 = arith.constant 0 : i32
    %c0_i32_0 = arith.constant 0 : i32
    %c0_i32_1 = arith.constant 0 : i32
    return %c0_i32, %c0_i32_0 : i32, i32
  }
  func.func @transform_2(%arg0: i32) -> (i32, i32) {
    %c0_i32 = arith.constant 0 : i32
    %c0_i32_0 = arith.constant 0 : i32
    %c0_i32_1 = arith.constant 0 : i32
    return %c0_i32, %c0_i32_0 : i32, i32
  }
  func.func @transform_3(%arg0: i32) -> (i32, i32) {
    %c0_i32 = arith.constant 0 : i32
    %c0_i32_0 = arith.constant 0 : i32
    return %arg0, %c0_i32 : i32, i32
  }
}

</mosaic_0001>

<bundles_post_ra>
// kernel: tpu_custom_call.1
= control target key start
LH: loop header
LB: loop body
LE: loop exit
PB: predicated region body
PF: predicated region fallthrough
CT: control target
= control target key end

     0   :  { %8 = vsyncpa [#allocation3], 0  ;;  %s670_s0 = inlined_call_operand.hbm [shape: f32[16,32], index: 0, kind: input, shape index: {}]   ;;  %s671_s1 = inlined_call_operand.vmem [shape: f32[1,32], index: 1, kind: input, shape index: {}]   ;;  %s672_s2 = inlined_call_operand.vmem [shape: f32[1,32], index: 2, kind: input, shape index: {}]   ;;  %s673_s3 = inlined_call_operand.hbm [shape: f32[16,32], index: 3, kind: output, shape index: {}]  }
   0x1   :  { %10 = vsyncpa [#allocation3 + $0x1], 0 }
   0x2   :  { %11 = vsyncpa [#allocation4], 0 }
   0x3   :  { %13 = vsyncpa [#allocation4 + $0x1], 0  ;;  %s496_s12 = smov 0   ;;  %s498_s13 = smov 0  }
   0x4   :  { %s500_s14 = smov 0   ;;  %s502_s15 = smov 0  }
   0x5 LB: > { %s517_s16 = sadd.s32 4294967295, %s472_s15   ;;  %s312_s17 = sadd.s32 4294967294, %s472_s15   ;;  %s472_s15 = sphi %s502_s15, %s688_s15   ;;  %s468_s14 = sphi %s500_s14, %s687_s14   ;;  %s464_s13 = sphi %s498_s13, %s686_s13   ;;  %s460_s12 = sphi %s496_s12, %s685_s12  }
   0x6   : > { %s521_s18 = sadd.s32 1, %s472_s15   ;;  %s26_s19 = sadd.s32 1, %s468_s14 }
   0x7   : > { %s23_s20 = ssub.s32 %s472_s15, %s521_s18  ;;  %p33_p0 = scmp.ne.s32.totalorder %s468_s14, %s464_s13 }
   0x8   : > { %p24_p1 = scmp.eq.s32.totalorder %s23_s20, 0  ;;  %p34_p2 = scmp.eq.s32.totalorder %s472_s15, 0 }
   0x9   : > { %p39_p3 = scmp.ne.s32.totalorder %s464_s13, %s460_s12  ;;  %p40_p4 = scmp.eq.s32.totalorder %s517_s16, 0 }
   0xa   : > { %s533_s21 = scalar_select %p24_p1, %s468_s14, %s26_s19  }
   0xb   : > { %p535_p5 = por %p34_p2, %p33_p0  ;;  %p539_p6 = por %p40_p4, %p39_p3 }
   0xc   : > { %p105_p7 = scmp.eq.s32.totalorder %s517_s16, 1  ;;  %p111_p8 = scmp.eq.s32.totalorder %s312_s17, 1 }
   0xd   : > { %p338_p10 = scmp.lt.s32.totalorder %s472_s15, 2  ;;  %s137_s26 = sand.u32 1, %s468_s14  }
   0xe   : > { %p546_p11 = por %p105_p7, %p33_p0  ;;  %p550_p12 = por %p111_p8, %p39_p3 }
   0xf   : > { %s316_s27 = sshll.u32 %s472_s15, 7  ;;  %s315_s28 = sshll.u32 %s137_s26, 3 }
  0x10   : > { %s677_s24 = scalar_select %p546_p11, 1, 0 }
  0x11   : > { %s678_s25 = scalar_select %p550_p12, 1, 0 }
  0x12   : > { %s559_s4 = scalar_lea.hbm %s670_s0, %s316_s27  ;;  %s141_s5 = scalar_lea.vmem [#allocation2], %s315_s28 }
  0x13   : > { %s148_s6 = sshll.u32 %s141_s5, 4  ;;  %p563_p13 = pnand %p338_p10, %p535_p5  ;;  %s567_s6 = int_to_ptr.vmem [resolvable:$true] %s148_s6 }
  0x14   : > { %s138_s8 = scalar_lea.sflag [#allocation3], %s137_s26  ;;  %s376_s9 = scalar_lea.hbm %s559_s4, 128 }
  0x15   : > { %p377_p2 = scmp.ne.s32.totalorder %s559_s4, %s376_s9  ;;  %p378_p3 = pneg %p563_p13 }
  0x16   : > { %s381_s17 = scalar_lea.hbm %s670_s0, 256  ;;  %p382_p5 = scmp.lt.u32.totalorder %s559_s4, %s670_s0 }
  0x17   : > { %p379_p4 = pnand %p378_p3, %p377_p2  ;;  %p383_p8 = scmp.lt.u32.totalorder %s381_s17, %s376_s9 }
  0x18   : > { %p385_p9 = scmp.lt.u32.totalorder %s376_s9, %s559_s4 }
  0x19   : > { %p380_p7 = pneg %p379_p4  ;;  %p384_p10 = por %p383_p8, %p382_p5 }
  0x1b   : > { %p386_p0 = por %p385_p9, %p384_p10 }
  0x1d   : > { %p387_p1 = pnand %p386_p0, %p380_p7 }
  0x1f   : > { %390 = shalt.err (!%p387_p1)
}
  0x20   : > { %s391_s22 = scalar_lea.vmem %s567_s6, 128  ;;  %s474_s26 = smov [#allocation2]  }
  0x21   : > { %p392_p2 = scmp.ne.s32.totalorder %s567_s6, %s391_s22  ;;  %s396_s27 = sshll.u32 %s474_s26, 4  ;;  %s397_s27 = int_to_ptr.vmem [resolvable:$false] %s396_s27 }
  0x22   : > { %s398_s28 = scalar_lea.vmem %s397_s27, 256  ;;  %p399_p11 = scmp.lt.s32.totalorder %s567_s6, %s397_s27 }
  0x23   : > { %p394_p4 = pnand %p392_p2, %p378_p3  ;;  %p400_p5 = scmp.lt.s32.totalorder %s398_s28, %s391_s22 }
  0x25   : > { %p395_p12 = pneg %p394_p4  ;;  %p401_p8 = por %p400_p5, %p399_p11 }
  0x27   : > { %p402_p9 = pnand %p401_p8, %p395_p12 }
  0x29   : > { %405 = shalt.err (!%p402_p9)
}
  0x2a   : > { %333 = dma.hbm_to_vmem [thread:$0]  (!%p563_p13), %s559_s4, 128, %s567_s6, %s138_s8  }
  0x2b   : > { %p680_p0 = scmp.lt.s32.totalorder %s472_s15, 3  ;;  %p681_p1 = scmp.ge.s32.totalorder %s472_s15, 1 }
  0x2d   : > { %p154_p3 = pnand %p681_p1, %p680_p0 }
  0x2e   : > { %s601_s29 = sand.u32 (!%p154_p3), 1, %s464_s13  }
  0x2f   : > { %157 = sbr.rel (%p154_p3) target bundleno = 404 (0x194), region = 32  ;;  %s318_s30 = sshll.u32 (!%p154_p3), %s601_s29, 3 }
  0x30   : > { %s160_s5 = scalar_lea.sflag (!%p154_p3), [#allocation3], %s601_s29  ;;  %s163_s7 = scalar_lea.vmem (!%p154_p3), [#allocation2], %s318_s30 }
  0x36   : > { %451 = dma.done.wait (%p539_p6), %s160_s5, 128  }
  0x37   : > { %453 = vsyncadd (%p539_p6), %s160_s5, 4294967168  ;;  %vm187_vm0 = vcmask 261120   ;;  %v186_v0 = vld [vmem:[%s163_s7] sm:$0xff]  ;;  %s323_s9 = sshll.u32 %s517_s16, 7  ;;  %s185_s10 = scalar_lea.vmem [#allocation5], %s318_s30 }
  0x38   : > { %v188_v1 = vsel %vm187_vm0, %v186_v0, 0.0  ;;  %v320_v19 = vld [vmem:[%s671_s1] ss:$0 sm:$0xff]  ;;  %s242_s11 = sshll.u32 %s185_s10, 4  ;;  %s625_s20 = scalar_lea.hbm %s673_s3, %s323_s9  ;;  %s627_s11 = int_to_ptr.vmem [resolvable:$true] %s242_s11 }
  0x39   : > { %189 = vadd.xlane.f32.xlu0 %v188_v1  ;;  %v321_v21 = vld [vmem:[%s672_s2] ss:$0 sm:$0xff]  ;;  %s229_s22 = scalar_lea.sflag [#allocation4], %s601_s29  ;;  %s406_s26 = scalar_lea.vmem %s627_s11, 128 }
  0x3a   : > { %p407_p6 = scmp.ne.s32.totalorder %s627_s11, %s406_s26  ;;  %p682_p11 = scmp.ne.s32.totalorder %s677_s24, 0 }
  0x3b   : > { %s475_s16 = smov [#allocation5]  }
  0x3c   : > { %p408_p12 = pnand %p407_p6, %p682_p11  ;;  %s410_s27 = sshll.u32 %s475_s16, 4  ;;  %s411_s27 = int_to_ptr.vmem [resolvable:$false] %s410_s27 }
  0x3d   : > { %s412_s28 = scalar_lea.vmem %s411_s27, 256  ;;  %p413_p7 = scmp.lt.s32.totalorder %s627_s11, %s411_s27 }
  0x3e   : > { %p409_p13 = pneg %p408_p12  ;;  %p414_p10 = scmp.lt.s32.totalorder %s412_s28, %s406_s26 }
  0x40   : > { %p415_p2 = por %p414_p10, %p413_p7 }
  0x42   : > { %p416_p4 = pnand %p415_p2, %p409_p13 }
  0xc6   : > { %v190_v2 = vpop.xlane.xlu0 %189 }
  0xc7   : > { %v191_v3 = vmul.f32 0.03125, %v190_v2 }
  0xc9   : > { %v192_v4 = vsub.f32 %v186_v0, %v191_v3 }
  0xcb   : > { %v193_v5 = vmul.f32 %v192_v4, %v192_v4 }
  0xcd   : > { %v194_v6 = vsel %vm187_vm0, %v193_v5, 0.0 }
  0xce   : > { %195 = vadd.xlane.f32.xlu0 %v194_v6 }
 0x15b   : > { %v196_v7 = vpop.xlane.xlu0 %195 }
 0x15c   : > { %v197_v8 = vmul.f32 0.032258064, %v196_v7 }
 0x15e   : > { %372 = vrsqrt.f32 %v197_v8  ;;  %vm200_vm1 = vcmp.eq.f32.partialorder %v197_v8, inf  ;;  %v203_v11 = vand.u32 2147483648, %v197_v8  ;;  %vm202_vm2 = vcmp.eq.f32.partialorder %v197_v8, 0.0 }
 0x168   : > { %v373_v9 = vpop.eup %372 }
 0x169   : > { %v199_v10 = vmul.f32 %v373_v9, %v197_v8 }
 0x16b   : > { %v201_v12 = vsel %vm200_vm1, %v197_v8, %v199_v10 }
 0x16c   : > { %v204_v13 = vsel %vm202_vm2, %v203_v11, %v201_v12 }
 0x16d   : > { %v205_v14 = vadd.f32 1e-06, %v204_v13 }
 0x16f   : > { %374 = vrcp.f32 %v205_v14 }
 0x179   : > { %v375_v15 = vpop.eup %374 }
 0x17a   : > { %v207_v16 = vmul.f32 %v375_v15, %v205_v14 }
 0x17c   : > { %v208_v17 = vsub.f32 2.0, %v207_v16 }
 0x17e   : > { %v209_v18 = vmul.f32 %v375_v15, %v208_v17 }
 0x180   : > { %v212_v20 = vmul.f32 %v209_v18, %v192_v4 }
 0x182   : > { %v219_v22 = vmul.f32 %v320_v19, %v212_v20 }
 0x184   : > { %v226_v23 = vadd.f32 %v321_v21, %v219_v22 }
 0x186   : > { %227 = vst.msk [vmem:[%s185_s10] sm:$0xff] %vm187_vm0, %v226_v23 }
 0x187   : > { %419 = shalt.err (!%p416_p4)
}
 0x188   : > { %s420_s29 = scalar_lea.hbm %s625_s20, 128  ;;  %s424_s7 = scalar_lea.hbm %s673_s3, 256 }
 0x189   : > { %p421_p5 = scmp.ne.s32.totalorder %s625_s20, %s420_s29  ;;  %p425_p0 = scmp.lt.u32.totalorder %s625_s20, %s673_s3 }
 0x18a   : > { %p426_p1 = scmp.lt.u32.totalorder %s424_s7, %s420_s29  ;;  %p428_p6 = scmp.lt.u32.totalorder %s420_s29, %s625_s20 }
 0x18b   : > { %p422_p8 = pnand %p421_p5, %p682_p11 }
 0x18c   : > { %p427_p3 = por %p426_p1, %p425_p0 }
 0x18d   : > { %p423_p9 = pneg %p422_p8 }
 0x18e   : > { %p429_p12 = por %p428_p6, %p427_p3 }
 0x190   : > { %p430_p13 = pnand %p429_p12, %p423_p9 }
 0x192   : > { %433 = shalt.err (!%p430_p13)
}
 0x193   : > { %328 = dma.vmem_to_hbm [thread:$0]  (%p682_p11), %s627_s11, 128, %s625_s20, %s229_s22  }
 0x194 PF: > { %s254_s6 = sand.u32 1, %s460_s12   ;;  %p683_p7 = scmp.ne.s32.totalorder %s678_s25, 0 }
 0x195   : > { %p684_p10 = scmp.ge.s32.totalorder %s472_s15, 2  ;;  %s255_s8 = scalar_lea.sflag [#allocation4], %s254_s6 }
 0x197   : > { %p335_p2 = pnand %p684_p10, %p683_p7 }
 0x199   : > { %455 = dma.done.wait (!%p335_p2), %s255_s8, 128  }
 0x19a   : > { %457 = vsyncadd (!%p335_p2), %s255_s8, 4294967168  ;;  %p16_p4 = scmp.ge.s32.totalorder %s521_s18, 4   ;;  %s685_s12 = smov %s464_s13 }
 0x19b   : > { %s686_s13 = smov %s468_s14  ;;  %s687_s14 = smov %s533_s21 }
 0x19c   : > { %s688_s15 = smov %s521_s18  ;;  %18 = sbr.rel (!%p16_p4) target bundleno = 5 (0x5), region = 77 }
 0x1a3   :  { %260 = vsyncpa [#allocation3], 1 }
 0x1a4   :  { %262 = vsyncpa [#allocation3 + $0x1], 1 }
 0x1a5   :  { %263 = vsyncpa [#allocation4], 1 }
 0x1a6   :  { %265 = vsyncpa [#allocation4 + $0x1], 1 }

</bundles_post_ra>
